<compile_context>
chip_gen: v7x
topology: tpu7x:2x2x1
jax: 0.10.0
libtpu: 0.0.40
codegen_flags: <defaults>
</compile_context>

<pallas_src>
import functools

import numpy as np
import jax
import jax.numpy as jnp
from jax.experimental import pallas as pl
from jax.experimental.pallas import tpu as pltpu


# ---------------------------------------------------------------------------
# Constant block-membership matrices (built once on host, shared by every
# batch element and every row band — their BlockSpec index is constant, so
# Pallas fetches them a single time).
# ---------------------------------------------------------------------------
def _pool_up_matrices(band_rows, W, kh, kw, w):
    """band_rows = th*kh image rows, W = w*kw image cols -> (pool, up)."""
    rows = np.arange(band_rows)
    cols = np.arange(W)
    block_id = (rows[:, None] // kh) * w + (cols[None, :] // kw)    # [rows, W]
    block_id = block_id.reshape(-1)                                 # [rows*W]
    n_blocks = (band_rows // kh) * w
    member = (block_id[:, None] == np.arange(n_blocks)[None, :])
    member = member.astype(np.float32)                              # [BHW, hwb]
    pool = member / float(kh * kw)           # average-pool weights
    up = np.ascontiguousarray(member.T)      # nearest-neighbour upsample (0/1)
    return jnp.asarray(pool), jnp.asarray(up)


def _pick_row_tile(h, w, branch_meta, vmem_budget=16 * 2**20):
    """Mini-rows per grid step.

    Candidates are divisors of h that keep every branch's block lane-aligned
    (th*w % 128 == 0) or th == h (full-extent block, no alignment needed).
    Among those, pick the LARGEST th whose per-step VMEM footprint (activations
    in+out, membership matrices, all counted double-buffered) fits the budget;
    fall back to the smallest aligned candidate.

    branch_meta: list of (c_i, kh_i, kw_i, W_i, itemsize_i).
    """
    def footprint(th):
        tot = 0
        for (c, kh, kw, W, isz) in branch_meta:
            bhw = th * kh * W
            tot += 2 * 2 * c * bhw * isz                       # in + out, 2x dbuf
            if kh * kw > 1:
                tot += 2 * 2 * (th * kh * W) * (th * w) * 4    # pool + up, 2x dbuf
        return tot

    cands = [d for d in range(1, h + 1)
             if h % d == 0 and (d == h or (d * w) % 128 == 0)]
    fitting = [d for d in cands if footprint(d) <= vmem_budget]
    if fitting:
        return max(fitting)
    return min(cands)


# ---------------------------------------------------------------------------
# Pallas kernel: pool -> 1x1 conv + ReLU -> 1x1 conv + Sigmoid -> reweight
# ---------------------------------------------------------------------------
def _crw_kernel(num_branches, needs_pool, ch_off, *refs):
    S = num_branches
    n_pool = sum(1 for f in needs_pool if f)

    p = 0
    x_refs = refs[p:p + S]; p += S            # each [1, C_i, BHW_i]
    pool_list = refs[p:p + n_pool]; p += n_pool
    up_list = refs[p:p + n_pool]; p += n_pool
    w1_refs = refs[p:p + S]; p += S            # each [Cmid, C_i]
    b1_ref = refs[p]; p += 1                   # [Cmid, 1]
    w2_ref = refs[p]; p += 1                   # [Ctot, Cmid]
    b2_ref = refs[p]; p += 1                   # [Ctot, 1]
    y_refs = refs[p:p + S]                     # each [1, C_i, BHW_i]

    pool_refs, up_refs = {}, {}
    j = 0
    for i in range(S):
        if needs_pool[i]:
            pool_refs[i], up_refs[i] = pool_list[j], up_list[j]
            j += 1

    # Adaptive avg-pool (block-membership matmul) + first 1x1 conv, split per
    # branch to avoid an in-kernel channel concat. Everything is [C, spatial]
    # so lanes carry the (long) spatial axis.
    z = b1_ref[...].astype(jnp.float32)                       # [Cmid, 1]
    for i in range(S):
        x = x_refs[i][0].astype(jnp.float32)                  # [C_i, BHW_i]
        if needs_pool[i]:
            pooled = jnp.dot(x, pool_refs[i][...],
                             preferred_element_type=jnp.float32)   # [C_i, hwb]
        else:
            pooled = x
        z = z + jnp.dot(w1_refs[i][...], pooled,
                        preferred_element_type=jnp.float32)        # [Cmid, hwb]
    z = jnp.maximum(z, 0.0)                                   # ReLU

    # Second 1x1 conv fused across branches + Sigmoid (EUP).
    att = jnp.dot(w2_ref[...], z, preferred_element_type=jnp.float32)
    att = jax.nn.sigmoid(att + b2_ref[...])                   # [Ctot, hwb]

    # Per-branch nearest upsample (membership matmul) + reweighting.
    # x is re-read from the VMEM ref (already resident) to keep live ranges
    # short instead of holding all branch tiles across both loops.
    for i in range(S):
        att_i = att[ch_off[i]:ch_off[i + 1], :]               # [C_i, hwb]
        if needs_pool[i]:
            scale = jnp.dot(att_i, up_refs[i][...],
                            preferred_element_type=jnp.float32)    # [C_i, BHW_i]
        else:
            scale = att_i
        x = x_refs[i][0]
        y_refs[i][0] = (x.astype(jnp.float32) * scale).astype(y_refs[i].dtype)


# ---------------------------------------------------------------------------
# Wrapper
# ---------------------------------------------------------------------------
def cross_resolution_weighting(xs, W1, b1, W2, b2, channels):
    """xs: list of NCHW arrays (decreasing resolution, last one is mini size).
       W1: [Ctot, Cmid], b1: [1, Cmid], W2: [Cmid, Ctot], b2: [1, Ctot]."""
    S = len(xs)
    N = xs[0].shape[0]
    h, w = int(xs[-1].shape[-2]), int(xs[-1].shape[-1])
    Ctot = sum(channels)
    Cmid = int(W1.shape[1])

    ks = []
    for x in xs:
        H, W = int(x.shape[-2]), int(x.shape[-1])
        assert H % h == 0 and W % w == 0, \
            "branch spatial sizes must be integer multiples of the mini size"
        ks.append((H // h, W // w))

    branch_meta = [(int(c), kh, kw, int(x.shape[-1]), x.dtype.itemsize)
                   for x, (kh, kw), c in zip(xs, ks, channels)]
    th = _pick_row_tile(h, w, branch_meta)    # mini-rows per grid step
    R = h // th
    needs_pool = tuple(kh * kw > 1 for (kh, kw) in ks)
    ch_off = tuple(int(v) for v in np.concatenate([[0], np.cumsum(channels)]))

    args, in_specs = [], []

    # Activations: free contiguous reshape NCHW -> [N, C, H*W] (no transpose).
    for x, (kh, kw) in zip(xs, ks):
        n, c, H, W = x.shape
        bhw = th * kh * W                      # pixels per row band
        args.append(x.reshape(n, c, H * W))
        in_specs.append(pl.BlockSpec((1, c, bhw), lambda n_, r: (n_, 0, r)))

    # Pool / upsample membership matrices (constant across grid steps).
    pools, ups = [], []
    for x, (kh, kw), flag in zip(xs, ks, needs_pool):
        if flag:
            pm, um = _pool_up_matrices(th * kh, int(x.shape[-1]), kh, kw, w)
            pools.append(pm)
            ups.append(um)
    for m in pools + ups:
        args.append(m)
        in_specs.append(pl.BlockSpec(m.shape, lambda n_, r: (0, 0)))

    # 1x1 conv weights, channel-major so kernel outputs stay [C, spatial].
    for i in range(S):
        w1t = jnp.transpose(W1[ch_off[i]:ch_off[i + 1], :])   # [Cmid, C_i]
        args.append(w1t)
        in_specs.append(pl.BlockSpec(w1t.shape, lambda n_, r: (0, 0)))
    b1c = jnp.reshape(b1, (Cmid, 1))
    args.append(b1c)
    in_specs.append(pl.BlockSpec(b1c.shape, lambda n_, r: (0, 0)))
    w2t = jnp.transpose(W2)                                    # [Ctot, Cmid]
    args.append(w2t)
    in_specs.append(pl.BlockSpec(w2t.shape, lambda n_, r: (0, 0)))
    b2c = jnp.reshape(b2, (Ctot, 1))
    args.append(b2c)
    in_specs.append(pl.BlockSpec(b2c.shape, lambda n_, r: (0, 0)))

    # Outputs mirror the (flattened) inputs.
    out_shape, out_specs = [], []
    for x, (kh, kw) in zip(xs, ks):
        n, c, H, W = x.shape
        bhw = th * kh * W
        out_shape.append(jax.ShapeDtypeStruct((n, c, H * W), x.dtype))
        out_specs.append(pl.BlockSpec((1, c, bhw), lambda n_, r: (n_, 0, r)))

    # Advisory cost estimate: tiny FLOPs, dominated by HBM bytes.
    flops = 0
    bytes_accessed = 0
    for x, (kh, kw), c in zip(xs, ks, channels):
        n, _, H, W = x.shape
        bytes_accessed += 2 * n * c * H * W * x.dtype.itemsize   # read + write
        flops += n * c * H * W                                    # reweight mul
        flops += 2 * n * Cmid * c * h * w                         # conv1 slice
        if kh * kw > 1:
            flops += 2 * 2 * n * c * H * W * (th * w)             # pool + upsample
    flops += 2 * N * Ctot * Cmid * h * w                          # conv2
    bytes_accessed += 4 * (W1.size + b1.size + W2.size + b2.size)
    transcendentals = N * Ctot * h * w                            # sigmoid
    cost = pl.CostEstimate(flops=int(flops),
                           transcendentals=int(transcendentals),
                           bytes_accessed=int(bytes_accessed))

    ys = pl.pallas_call(
        functools.partial(_crw_kernel, S, needs_pool, ch_off),
        grid=(N, R),
        in_specs=in_specs,
        out_specs=tuple(out_specs),
        out_shape=tuple(out_shape),
        compiler_params=pltpu.CompilerParams(
            dimension_semantics=("parallel", "parallel"),
            vmem_limit_bytes=32 * 1024 * 1024),
        cost_estimate=cost,
    )(*args)

    # Free reshape back to NCHW (no transpose).
    return [y.reshape(x.shape) for y, x in zip(ys, xs)]


# ---------------------------------------------------------------------------
# Pure-JAX reference (mirrors the PyTorch forward for divisible sizes)
# ---------------------------------------------------------------------------
def reference(xs, W1, b1, W2, b2, channels):
    h, w = int(xs[-1].shape[-2]), int(xs[-1].shape[-1])
    pooled = []
    for x in xs[:-1]:
        N, C, H, W = x.shape
        kh, kw = H // h, W // w
        pooled.append(x.reshape(N, C, h, kh, w, kw).mean(axis=(3, 5)))
    pooled.append(xs[-1])
    feat = jnp.concatenate(pooled, axis=1)                         # [N,Ctot,h,w]
    z = jnp.einsum("nchw,cd->ndhw", feat, W1) + b1[0][None, :, None, None]
    z = jnp.maximum(z, 0.0)
    a = jnp.einsum("ndhw,dc->nchw", z, W2) + b2[0][None, :, None, None]
    a = jax.nn.sigmoid(a)
    outs, start = [], 0
    for x, c in zip(xs, channels):
        ai = a[:, start:start + c]
        start += c
        H, W = x.shape[-2:]
        up = jnp.repeat(jnp.repeat(ai, H // h, axis=2), W // w, axis=3)
        outs.append(x * up)
    return outs


def _run_case(key, channels, ratio, shapes):
    total = sum(channels)
    cmid = max(1, total // ratio)
    keys = jax.random.split(key, 4 + len(shapes))
    W1 = jax.random.normal(keys[0], (total, cmid), jnp.float32) * 0.1
    b1 = jax.random.normal(keys[1], (1, cmid), jnp.float32) * 0.1
    W2 = jax.random.normal(keys[2], (cmid, total), jnp.float32) * 0.1
    b2 = jax.random.normal(keys[3], (1, total), jnp.float32) * 0.1
    xs = [jax.random.normal(k, s, jnp.float32) for k, s in zip(keys[4:], shapes)]

    outs = cross_resolution_weighting(xs, W1, b1, W2, b2, channels)
    outs = jax.block_until_ready(outs)

    refs = reference(xs, W1, b1, W2, b2, channels)
    for o, r in zip(outs, refs):
        assert o.shape == r.shape and o.dtype == r.dtype
        max_err = float(jnp.max(jnp.abs(o - r)))
        assert max_err < 1e-4, f"mismatch: {max_err}"


if __name__ == "__main__":
    key = jax.random.PRNGKey(0)
    k_a, k_b = jax.random.split(key, 2)

    # Case A: channels=(16, 32), ratio=4 -> Ctot=48, Cmid=12; mini plane is
    # small so the whole plane is one band (R == 1).
    _run_case(k_a, channels=(16, 32), ratio=4,
              shapes=[(2, 16, 16, 16), (2, 32, 8, 8)])

    # Case B: larger mini plane (16x128) -> exercises the row-band path (R > 1)
    # with lane-aligned per-band blocks.
    _run_case(k_b, channels=(8, 16), ratio=4,
              shapes=[(1, 8, 32, 256), (1, 16, 16, 128)])

    print("KERNEL_OK")
</pallas_src>

<mosaic_0001>
module attributes {stable_mosaic.version = 11 : i64} {
  func.func @_crw_kernel(%arg0: i32, %arg1: i32, %arg2: memref<1x16x256xf32, #tpu.memory_space<vmem>>, %arg3: memref<1x32x64xf32, #tpu.memory_space<vmem>>, %arg4: memref<256x64xf32, #tpu.memory_space<vmem>>, %arg5: memref<64x256xf32, #tpu.memory_space<vmem>>, %arg6: memref<12x16xf32, #tpu.memory_space<vmem>>, %arg7: memref<12x32xf32, #tpu.memory_space<vmem>>, %arg8: memref<12x1xf32, #tpu.memory_space<vmem>>, %arg9: memref<48x12xf32, #tpu.memory_space<vmem>>, %arg10: memref<48x1xf32, #tpu.memory_space<vmem>>, %arg11: memref<1x16x256xf32, #tpu.memory_space<vmem>>, %arg12: memref<1x32x64xf32, #tpu.memory_space<vmem>>) attributes {dimension_semantics = [#tpu.dimension_semantics<parallel>, #tpu.dimension_semantics<parallel>], iteration_bounds = array<i64: 2, 1>, scalar_prefetch = 0 : i64, scratch_operands = 0 : i64, tpu.core_type = #tpu.core_type<tc>, window_params = [{transform_indices = @transform_0, window_bounds = array<i64: 1, 16, 256>}, {transform_indices = @transform_1, window_bounds = array<i64: 1, 32, 64>}, {pipeline_mode = #tpu.pipeline_mode<synchronous>, transform_indices = @transform_2, window_bounds = array<i64: 256, 64>}, {pipeline_mode = #tpu.pipeline_mode<synchronous>, transform_indices = @transform_3, window_bounds = array<i64: 64, 256>}, {pipeline_mode = #tpu.pipeline_mode<synchronous>, transform_indices = @transform_4, window_bounds = array<i64: 12, 16>}, {pipeline_mode = #tpu.pipeline_mode<synchronous>, transform_indices = @transform_5, window_bounds = array<i64: 12, 32>}, {pipeline_mode = #tpu.pipeline_mode<synchronous>, transform_indices = @transform_6, window_bounds = array<i64: 12, 1>}, {pipeline_mode = #tpu.pipeline_mode<synchronous>, transform_indices = @transform_7, window_bounds = array<i64: 48, 12>}, {pipeline_mode = #tpu.pipeline_mode<synchronous>, transform_indices = @transform_8, window_bounds = array<i64: 48, 1>}, {transform_indices = @transform_9, window_bounds = array<i64: 1, 16, 256>}, {transform_indices = @transform_10, window_bounds = array<i64: 1, 32, 64>}]} {
    %c0 = arith.constant 0 : index
    %c0_0 = arith.constant 0 : index
    %0 = vector.load %arg8[%c0, %c0_0] : memref<12x1xf32, #tpu.memory_space<vmem>>, vector<12x1xf32>
    %c0_1 = arith.constant 0 : index
    %c0_2 = arith.constant 0 : index
    %c0_3 = arith.constant 0 : index
    %1 = vector.load %arg2[%c0_1, %c0_2, %c0_3] : memref<1x16x256xf32, #tpu.memory_space<vmem>>, vector<1x16x256xf32>
    %2 = vector.shape_cast %1 : vector<1x16x256xf32> to vector<16x256xf32>
    %c0_4 = arith.constant 0 : index
    %c0_5 = arith.constant 0 : index
    %3 = vector.load %arg4[%c0_4, %c0_5] : memref<256x64xf32, #tpu.memory_space<vmem>>, vector<256x64xf32>
    %cst = arith.constant dense<0.000000e+00> : vector<16x64xf32>
    %4 = tpu.matmul %2, %3, %cst {dimension_numbers = #tpu.dot_dimension_numbers<[1], [0], [0], [1], [0, 0, 1, 1], [], []>} : vector<16x256xf32>, vector<256x64xf32>, vector<16x64xf32> -> vector<16x64xf32>
    %c0_6 = arith.constant 0 : index
    %c0_7 = arith.constant 0 : index
    %5 = vector.load %arg6[%c0_6, %c0_7] : memref<12x16xf32, #tpu.memory_space<vmem>>, vector<12x16xf32>
    %cst_8 = arith.constant dense<0.000000e+00> : vector<12x64xf32>
    %6 = tpu.matmul %5, %4, %cst_8 {dimension_numbers = #tpu.dot_dimension_numbers<[1], [0], [0], [1], [0, 0, 1, 1], [], []>} : vector<12x16xf32>, vector<16x64xf32>, vector<12x64xf32> -> vector<12x64xf32>
    %7 = vector.broadcast %0 : vector<12x1xf32> to vector<12x64xf32>
    %8 = arith.addf %7, %6 : vector<12x64xf32>
    %c0_9 = arith.constant 0 : index
    %c0_10 = arith.constant 0 : index
    %c0_11 = arith.constant 0 : index
    %9 = vector.load %arg3[%c0_9, %c0_10, %c0_11] : memref<1x32x64xf32, #tpu.memory_space<vmem>>, vector<1x32x64xf32>
    %10 = vector.shape_cast %9 : vector<1x32x64xf32> to vector<32x64xf32>
    %c0_12 = arith.constant 0 : index
    %c0_13 = arith.constant 0 : index
    %11 = vector.load %arg7[%c0_12, %c0_13] : memref<12x32xf32, #tpu.memory_space<vmem>>, vector<12x32xf32>
    %cst_14 = arith.constant dense<0.000000e+00> : vector<12x64xf32>
    %12 = tpu.matmul %11, %10, %cst_14 {dimension_numbers = #tpu.dot_dimension_numbers<[1], [0], [0], [1], [0, 0, 1, 1], [], []>} : vector<12x32xf32>, vector<32x64xf32>, vector<12x64xf32> -> vector<12x64xf32>
    %13 = arith.addf %8, %12 : vector<12x64xf32>
    %cst_15 = arith.constant 0.000000e+00 : f32
    %14 = vector.broadcast %cst_15 : f32 to vector<12x64xf32>
    %15 = arith.maximumf %13, %14 : vector<12x64xf32>
    %c0_16 = arith.constant 0 : index
    %c0_17 = arith.constant 0 : index
    %16 = vector.load %arg9[%c0_16, %c0_17] : memref<48x12xf32, #tpu.memory_space<vmem>>, vector<48x12xf32>
    %cst_18 = arith.constant dense<0.000000e+00> : vector<48x64xf32>
    %17 = tpu.matmul %16, %15, %cst_18 {dimension_numbers = #tpu.dot_dimension_numbers<[1], [0], [0], [1], [0, 0, 1, 1], [], []>} : vector<48x12xf32>, vector<12x64xf32>, vector<48x64xf32> -> vector<48x64xf32>
    %c0_19 = arith.constant 0 : index
    %c0_20 = arith.constant 0 : index
    %18 = vector.load %arg10[%c0_19, %c0_20] : memref<48x1xf32, #tpu.memory_space<vmem>>, vector<48x1xf32>
    %19 = vector.broadcast %18 : vector<48x1xf32> to vector<48x64xf32>
    %20 = arith.addf %17, %19 : vector<48x64xf32>
    %21 = arith.negf %20 : vector<48x64xf32>
    %22 = math.exp %21 : vector<48x64xf32>
    %cst_21 = arith.constant 1.000000e+00 : f32
    %23 = vector.broadcast %cst_21 : f32 to vector<48x64xf32>
    %24 = arith.addf %23, %22 : vector<48x64xf32>
    %25 = arith.divf %23, %24 : vector<48x64xf32>
    %26 = vector.extract_strided_slice %25 {offsets = [0, 0], sizes = [16, 64], strides = [1, 1]} : vector<48x64xf32> to vector<16x64xf32>
    %c0_22 = arith.constant 0 : index
    %c0_23 = arith.constant 0 : index
    %27 = vector.load %arg5[%c0_22, %c0_23] : memref<64x256xf32, #tpu.memory_space<vmem>>, vector<64x256xf32>
    %cst_24 = arith.constant dense<0.000000e+00> : vector<16x256xf32>
    %28 = tpu.matmul %26, %27, %cst_24 {dimension_numbers = #tpu.dot_dimension_numbers<[1], [0], [0], [1], [0, 0, 1, 1], [], []>} : vector<16x64xf32>, vector<64x256xf32>, vector<16x256xf32> -> vector<16x256xf32>
    %c0_25 = arith.constant 0 : index
    %c0_26 = arith.constant 0 : index
    %c0_27 = arith.constant 0 : index
    %29 = vector.load %arg2[%c0_25, %c0_26, %c0_27] : memref<1x16x256xf32, #tpu.memory_space<vmem>>, vector<1x16x256xf32>
    %30 = vector.shape_cast %29 : vector<1x16x256xf32> to vector<16x256xf32>
    %31 = arith.mulf %30, %28 : vector<16x256xf32>
    %c0_28 = arith.constant 0 : index
    %c0_29 = arith.constant 0 : index
    %c0_30 = arith.constant 0 : index
    %32 = vector.load %arg11[%c0_28, %c0_29, %c0_30] : memref<1x16x256xf32, #tpu.memory_space<vmem>>, vector<1x16x256xf32>
    %33 = vector.shape_cast %32 : vector<1x16x256xf32> to vector<16x256xf32>
    %34 = vector.shape_cast %31 : vector<16x256xf32> to vector<1x16x256xf32>
    tpu.vector_store %arg11[%c0_28, %c0_29, %c0_30], %34 {strides = array<i32>} : memref<1x16x256xf32, #tpu.memory_space<vmem>>, vector<1x16x256xf32>,
    %35 = vector.extract_strided_slice %25 {offsets = [16, 0], sizes = [32, 64], strides = [1, 1]} : vector<48x64xf32> to vector<32x64xf32>
    %c0_31 = arith.constant 0 : index
    %c0_32 = arith.constant 0 : index
    %c0_33 = arith.constant 0 : index
    %36 = vector.load %arg3[%c0_31, %c0_32, %c0_33] : memref<1x32x64xf32, #tpu.memory_space<vmem>>, vector<1x32x64xf32>
    %37 = vector.shape_cast %36 : vector<1x32x64xf32> to vector<32x64xf32>
    %38 = arith.mulf %37, %35 : vector<32x64xf32>
    %c0_34 = arith.constant 0 : index
    %c0_35 = arith.constant 0 : index
    %c0_36 = arith.constant 0 : index
    %39 = vector.load %arg12[%c0_34, %c0_35, %c0_36] : memref<1x32x64xf32, #tpu.memory_space<vmem>>, vector<1x32x64xf32>
    %40 = vector.shape_cast %39 : vector<1x32x64xf32> to vector<32x64xf32>
    %41 = vector.shape_cast %38 : vector<32x64xf32> to vector<1x32x64xf32>
    tpu.vector_store %arg12[%c0_34, %c0_35, %c0_36], %41 {strides = array<i32>} : memref<1x32x64xf32, #tpu.memory_space<vmem>>, vector<1x32x64xf32>,
    return
  }
  func.func @transform_0(%arg0: i32, %arg1: i32) -> (i32, i32, i32) {
    %c0_i32 = arith.constant 0 : i32
    %c0_i32_0 = arith.constant 0 : i32
    return %arg0, %c0_i32, %arg1 : i32, i32, i32
  }
  func.func @transform_1(%arg0: i32, %arg1: i32) -> (i32, i32, i32) {
    %c0_i32 = arith.constant 0 : i32
    %c0_i32_0 = arith.constant 0 : i32
    return %arg0, %c0_i32, %arg1 : i32, i32, i32
  }
  func.func @transform_2(%arg0: i32, %arg1: i32) -> (i32, i32) {
    %c0_i32 = arith.constant 0 : i32
    %c0_i32_0 = arith.constant 0 : i32
    %c0_i32_1 = arith.constant 0 : i32
    return %c0_i32, %c0_i32_0 : i32, i32
  }
  func.func @transform_3(%arg0: i32, %arg1: i32) -> (i32, i32) {
    %c0_i32 = arith.constant 0 : i32
    %c0_i32_0 = arith.constant 0 : i32
    %c0_i32_1 = arith.constant 0 : i32
    return %c0_i32, %c0_i32_0 : i32, i32
  }
  func.func @transform_4(%arg0: i32, %arg1: i32) -> (i32, i32) {
    %c0_i32 = arith.constant 0 : i32
    %c0_i32_0 = arith.constant 0 : i32
    %c0_i32_1 = arith.constant 0 : i32
    return %c0_i32, %c0_i32_0 : i32, i32
  }
  func.func @transform_5(%arg0: i32, %arg1: i32) -> (i32, i32) {
    %c0_i32 = arith.constant 0 : i32
    %c0_i32_0 = arith.constant 0 : i32
    %c0_i32_1 = arith.constant 0 : i32
    return %c0_i32, %c0_i32_0 : i32, i32
  }
  func.func @transform_6(%arg0: i32, %arg1: i32) -> (i32, i32) {
    %c0_i32 = arith.constant 0 : i32
    %c0_i32_0 = arith.constant 0 : i32
    %c0_i32_1 = arith.constant 0 : i32
    return %c0_i32, %c0_i32_0 : i32, i32
  }
  func.func @transform_7(%arg0: i32, %arg1: i32) -> (i32, i32) {
    %c0_i32 = arith.constant 0 : i32
    %c0_i32_0 = arith.constant 0 : i32
    %c0_i32_1 = arith.constant 0 : i32
    return %c0_i32, %c0_i32_0 : i32, i32
  }
  func.func @transform_8(%arg0: i32, %arg1: i32) -> (i32, i32) {
    %c0_i32 = arith.constant 0 : i32
    %c0_i32_0 = arith.constant 0 : i32
    %c0_i32_1 = arith.constant 0 : i32
    return %c0_i32, %c0_i32_0 : i32, i32
  }
  func.func @transform_9(%arg0: i32, %arg1: i32) -> (i32, i32, i32) {
    %c0_i32 = arith.constant 0 : i32
    %c0_i32_0 = arith.constant 0 : i32
    return %arg0, %c0_i32, %arg1 : i32, i32, i32
  }
  func.func @transform_10(%arg0: i32, %arg1: i32) -> (i32, i32, i32) {
    %c0_i32 = arith.constant 0 : i32
    %c0_i32_0 = arith.constant 0 : i32
    return %arg0, %c0_i32, %arg1 : i32, i32, i32
  }
}

</mosaic_0001>

<bundles_post_ra>
// kernel: tpu_custom_call.1
= control target key start
LH: loop header
LB: loop body
LE: loop exit
PB: predicated region body
PF: predicated region fallthrough
CT: control target
= control target key end

     0   :  { %16 = vsyncpa [#allocation3], 0  ;;  %s2104_s0 = inlined_call_operand.vmem [shape: f32[2,16,256], index: 0, kind: input, shape index: {}]   ;;  %s2105_s1 = inlined_call_operand.vmem [shape: f32[2,32,64], index: 1, kind: input, shape index: {}]   ;;  %s2106_s2 = inlined_call_operand.vmem [shape: f32[256,64], index: 2, kind: input, shape index: {}]   ;;  %s2107_s3 = inlined_call_operand.vmem [shape: f32[64,256], index: 3, kind: input, shape index: {}]   ;;  %s2108_s4 = inlined_call_operand.vmem [shape: f32[12,16], index: 4, kind: input, shape index: {}]   ;;  %s2109_s5 = inlined_call_operand.vmem [shape: f32[12,32], index: 5, kind: input, shape index: {}]   ;;  %s2110_s6 = inlined_call_operand.vmem [shape: f32[12,1], index: 6, kind: input, shape index: {}]   ;;  %s2111_s7 = inlined_call_operand.vmem [shape: f32[48,12], index: 7, kind: input, shape index: {}]   ;;  %s2112_s8 = inlined_call_operand.vmem [shape: f32[48,1], index: 8, kind: input, shape index: {}]   ;;  %s2113_s9 = inlined_call_operand.hbm [shape: f32[2,16,256], index: 9, kind: output, shape index: {0}]   ;;  %s2114_s10 = inlined_call_operand.hbm [shape: f32[2,32,64], index: 10, kind: output, shape index: {1}]  }
   0x1   :  { %18 = vsyncpa [#allocation3 + $0x1], 0 }
   0x2   :  { %19 = vsyncpa [#allocation5], 0 }
   0x3   :  { %21 = vsyncpa [#allocation5 + $0x1], 0  ;;  %s1687_s13 = smov 0   ;;  %s1689_s14 = smov 0  }
   0x4   :  { %s1691_s15 = smov 0   ;;  %s1693_s16 = smov 0  }
   0x5   :  { %s1695_s17 = smov 0   ;;  %s1697_s18 = smov 0  }
   0x6 LB: > { %2118 = sst [smem:[#allocation8_spill]] %s1617_s17  ;;  %s1219_s19 = sadd.s32 4294967295, %s1621_s18   ;;  %s1621_s18 = sphi %s1697_s18, %s27_s18   ;;  %s1617_s17 = sphi %s1695_s17, %s2126_s17   ;;  %s1613_s16 = sphi %s1693_s16, %s2125_s16   ;;  %s1609_s15 = sphi %s1691_s15, %s2129_s15   ;;  %s1605_s14 = sphi %s1689_s14, %s2128_s14   ;;  %s1601_s13 = sphi %s1687_s13, %s2127_s13  }
   0x7   : > { %s1220_s20 = sadd.s32 4294967294, %s1621_s18   ;;  %s39_s21 = sadd.s32 1, %s1617_s17 }
   0x8   : > { %s251_s22 = sadd.s32 1, %s1609_s15  ;;  %p41_p0 = scmp.ge.s32.totalorder %s39_s21, 2 }
   0x9   : > { %p261_p1 = scmp.ne.s32.totalorder %s1609_s15, %s1605_s14  ;;  %p262_p2 = scmp.eq.s32.totalorder %s1219_s19, 1 }
   0xa   : > { %p267_p3 = scmp.ne.s32.totalorder %s1605_s14, %s1601_s13  ;;  %s2131_s21 = smov (%p41_p0, %s39_s21), 0 }
   0xb   : > { %2119 = sst [smem:[#allocation9_spill]] %s2131_s21  ;;  %p1727_p4 = por %p262_p2, %p261_p1 }
   0xc   : > { %p268_p5 = scmp.eq.s32.totalorder %s1220_s20, 1  ;;  %s246_s24 = ssub.s32 %s1617_s17, %s2131_s21 }
   0xd   : > { %p1223_p6 = scmp.ge.s32.totalorder %s1621_s18, 1  ;;  %p249_p7 = scmp.eq.s32.totalorder %s246_s24, 0 }
   0xe   : > { %p1734_p8 = por %p268_p5, %p267_p3  ;;  %p359_p9 = scmp.lt.s32.totalorder %s1621_s18, 3 }
   0xf   : > { %s1740_s26 = scalar_select %p249_p7, %s1609_s15, %s251_s22  }
  0x10   : > { %p360_p10 = pnand %p1223_p6, %p359_p9 }
  0x11   : > { %2122 = sst [smem:[#allocation10_spill]] %s1740_s26  ;;  %v455_v0 = vld [vmem:[%s2106_s2 + $0x80] sm:$0xff] (!%p360_p10)  ;;  %v456_v1 = vld [vmem:[%s2106_s2 + $0x88] sm:$0xff] (!%p360_p10)  ;;  %p415_p11 = scmp.lt.s32.totalorder (!%p360_p10), %s1613_s16, 1  ;;  %v457_v5 = vld [vmem:[%s2106_s2 + $0x90] sm:$0xff] (!%p360_p10)  ;;  %vm548_vm0 = vcmask (!%p360_p10), 130048  }
  0x12   : > { %363 = sbr.rel (%p360_p10) target bundleno = 983 (0x3d7), region = 56  ;;  %v439_v2 = vld [vmem:[%s2106_s2] sm:$0xff] (!%p360_p10)  ;;  %v1348_v3 = vpack.c.bf16 (!%p360_p10), %v456_v1, %v455_v0  ;;  %v440_v4 = vld [vmem:[%s2106_s2 + $0x8] sm:$0xff] (!%p360_p10)  ;;  %v458_v6 = vld [vmem:[%s2106_s2 + $0x98] sm:$0xff] (!%p360_p10)  ;;  %v1623_v54 = vmov (!%p360_p10), 0   ;;  %vm648_vm1 = vcmask (!%p360_p10), 261120  }
  0x13   : > { %v1350_v7 = vpack.c.bf16 (!%p360_p10), %v440_v4, %v439_v2  ;;  %v1352_v8 = vpack.c.bf16 (!%p360_p10), %v458_v6, %v457_v5  ;;  %v441_v9 = vld [vmem:[%s2106_s2 + $0x10] sm:$0xff] (!%p360_p10)  ;;  %v442_v10 = vld [vmem:[%s2106_s2 + $0x18] sm:$0xff] (!%p360_p10)  ;;  %v459_v11 = vld [vmem:[%s2106_s2 + $0xa0] sm:$0xff] (!%p360_p10)  ;;  %1485 = vset.pattern.permute.xlu0 (!%p360_p10), %v1623_v54  ;;  %1486 = vset.pattern.permute.xlu1 (!%p360_p10), %v1623_v54  ;;  %vm776_vm2 = vcmask (!%p360_p10), 97280   ;;  %vm795_vm3 = vcmask (!%p360_p10), 1043456   ;;  %s1994_s30 = sand.u32 (!%p360_p10), 1, %s1605_s14  }
  0x14   : > { %1349 = vmatprep.subr.bf16.mxu0 (!%p360_p10), %v1348_v3  ;;  %v460_v12 = vld [vmem:[%s2106_s2 + $0xa8] sm:$0xff] (!%p360_p10)  ;;  %v1354_v13 = vpack.c.bf16 (!%p360_p10), %v442_v10, %v441_v9  ;;  %v443_v15 = vld [vmem:[%s2106_s2 + $0x20] sm:$0xff] (!%p360_p10)  ;;  %v461_v17 = vld [vmem:[%s2106_s2 + $0xb0] sm:$0xff] (!%p360_p10)  ;;  %vm1624_vm4 = vmmov (!%p360_p10), 1   ;;  %vm946_vm6 = vcmask (!%p360_p10), 523264   ;;  %s1224_s11 = sshll.u32 (!%p360_p10), %s1994_s30, 5 }
  0x15   : > { %1351 = vmatpush3.bf16.msra.mxu0 (!%p360_p10), %v1350_v7  ;;  %v1356_v14 = vpack.c.bf16 (!%p360_p10), %v460_v12, %v459_v11  ;;  %v444_v16 = vld [vmem:[%s2106_s2 + $0x28] sm:$0xff] (!%p360_p10)  ;;  %v462_v18 = vld [vmem:[%s2106_s2 + $0xb8] sm:$0xff] (!%p360_p10)  ;;  %v445_v21 = vld [vmem:[%s2106_s2 + $0x30] sm:$0xff] (!%p360_p10)  ;;  %s413_s12 = scalar_lea.vmem (!%p360_p10), [#allocation4], %s1224_s11  ;;  %s2117_s19 = sshll.u32 (!%p360_p10), %s1613_s16, 9 }
  0x16   : > { %1353 = vmatprep.subr.bf16.mxu0 (!%p360_p10), %v1352_v8  ;;  %v1358_v19 = vpack.c.bf16 (!%p360_p10), %v444_v16, %v443_v15  ;;  %v1360_v20 = vpack.c.bf16 (!%p360_p10), %v462_v18, %v461_v17  ;;  %v446_v22 = vld [vmem:[%s2106_s2 + $0x38] sm:$0xff] (!%p360_p10)  ;;  %v463_v23 = vld [vmem:[%s2106_s2 + $0xc0] sm:$0xff] (!%p360_p10)  ;;  %v464_v24 = vld [vmem:[%s2106_s2 + $0xc8] sm:$0xff] (!%p360_p10)  ;;  %s1088_s21 = sshll.u32 (!%p360_p10), %s413_s12, 4  ;;  %s1626_s27 = smov (!%p360_p10), [#allocation4]   ;;  %s2010_s21 = int_to_ptr.vmem [resolvable:$true] %s1088_s21 }
  0x17   : > { %v1362_v26 = vpack.c.bf16 (!%p360_p10), %v446_v22, %v445_v21  ;;  %v1364_v27 = vpack.c.bf16 (!%p360_p10), %v464_v24, %v463_v23  ;;  %v447_v28 = vld [vmem:[%s2106_s2 + $0x40] sm:$0xff] (!%p360_p10)  ;;  %v448_v29 = vld [vmem:[%s2106_s2 + $0x48] sm:$0xff] (!%p360_p10)  ;;  %v465_v30 = vld [vmem:[%s2106_s2 + $0xd0] sm:$0xff] (!%p360_p10)  ;;  %s1511_s24 = scalar_lea.vmem (!%p360_p10), %s2010_s21, 512 }
  0x18   : > { %v466_v31 = vld [vmem:[%s2106_s2 + $0xd8] sm:$0xff] (!%p360_p10)  ;;  %v1366_v32 = vpack.c.bf16 (!%p360_p10), %v448_v29, %v447_v28  ;;  %v449_v34 = vld [vmem:[%s2106_s2 + $0x50] sm:$0xff] (!%p360_p10)  ;;  %v467_v36 = vld [vmem:[%s2106_s2 + $0xe0] sm:$0xff] (!%p360_p10)  ;;  %p1512_p12 = scmp.ne.s32.totalorder (!%p360_p10), %s2010_s21, %s1511_s24 }
  0x19   : > { %s1771_s22 = scalar_select %p415_p11, %s1613_s16, 1  ;;  %1355 = vmatpush3.bf16.msra.mxu0 %v1354_v13  ;;  %v1368_v33 = vpack.c.bf16 %v466_v31, %v465_v30  ;;  %v450_v35 = vld [vmem:[%s2106_s2 + $0x58] sm:$0xff]  ;;  %v468_v37 = vld [vmem:[%s2106_s2 + $0xe8] sm:$0xff]  ;;  %v451_v40 = vld [vmem:[%s2106_s2 + $0x60] sm:$0xff] }
  0x1a   : > { %1357 = vmatprep.subr.bf16.mxu0 %v1356_v14  ;;  %v1370_v38 = vpack.c.bf16 %v450_v35, %v449_v34  ;;  %v1372_v39 = vpack.c.bf16 %v468_v37, %v467_v36  ;;  %v452_v41 = vld [vmem:[%s2106_s2 + $0x68] sm:$0xff]  ;;  %v469_v42 = vld [vmem:[%s2106_s2 + $0xf0] sm:$0xff]  ;;  %v470_v43 = vld [vmem:[%s2106_s2 + $0xf8] sm:$0xff]  ;;  %p1513_p13 = pnand %p1512_p12, %p1727_p4 }
  0x1b   : > { %s1257_s28 = sshll.u32 %s1771_s22, 5  ;;  %v1374_v44 = vpack.c.bf16 %v452_v41, %v451_v40  ;;  %v1376_v45 = vpack.c.bf16 %v470_v43, %v469_v42  ;;  %v453_v46 = vld [vmem:[%s2106_s2 + $0x70] sm:$0xff]  ;;  %v454_v47 = vld [vmem:[%s2106_s2 + $0x78] sm:$0xff]  ;;  %v546_v52 = vld [vmem:[%s2108_s4] sm:$0xff]  ;;  %s2017_s22 = scalar_lea.hbm %s2114_s10, %s2117_s19 }
  0x1c   : > { %s1794_s26 = scalar_lea.vmem %s2104_s0, %s1257_s28  ;;  %v1378_v48 = vpack.c.bf16 %v454_v47, %v453_v46  ;;  %1321 = vmatprep.mubr.msk.f32.mxu1 %vm548_vm0, %v546_v52  ;;  %v433_v53 = vld [vmem:[%s2110_s6] sm:$0xff]  ;;  %v434_v55 = vld [vmem:[%s2110_s6 + $0x8] sm:$0xf]  ;;  %v742_v56 = vld [vmem:[%s2112_s8 + $0x10] sm:$0xff]  ;;  %s431_s20 = scalar_lea.vmem %s2105_s1, %s1257_s28 }
  0x1d   : > { %v1809_v25 = vld [vmem:[%s1794_s26 + $0x8] sm:$0xff]  ;;  %1359 = vmatpush3.bf16.msra.mxu0 %v1358_v19  ;;  %v1855_v49 = vld [vmem:[%s1794_s26] sm:$0xff]  ;;  %v1858_v50 = vld [vmem:[%s1794_s26 + $0x18] sm:$0xff]  ;;  %632 = vperm.xlu0 %1485, %v433_v53   ;;  %s1056_s28 = scalar_lea.sflag [#allocation5], %s1994_s30  ;;  %p1514_p0 = pneg %p1513_p13 }
  0x1e   : > { %535 = vmatprep.mubr.f32.mxu0 %v1809_v25  ;;  %1361 = vmatprep.subr.bf16.mxu0 %v1360_v20  ;;  %v1863_v51 = vld [vmem:[%s1794_s26 + $0x10] sm:$0xff]  ;;  %v744_v57 = vld [vmem:[%s2112_s8 + $0x20] sm:$0xff]  ;;  %v1889_v0 = vld [vmem:[%s431_s20 + $0x8] sm:$0xff]  ;;  %s1515_s26 = sshll.u32 %s1626_s27, 4  ;;  %s1516_s26 = int_to_ptr.vmem [resolvable:$false] %s1515_s26 }
  0x1f   : > { %v1887_v63 = vld [vmem:[%s431_s20] sm:$0xff]  ;;  %v1893_v4 = vld [vmem:[%s431_s20 + $0x10] sm:$0xff]  ;;  %v1895_v5 = vld [vmem:[%s431_s20 + $0x18] sm:$0xff]  ;;  %s1517_s29 = scalar_lea.vmem %s1516_s26, 1024  ;;  %p1518_p1 = scmp.lt.s32.totalorder %s2010_s21, %s1516_s26 }
  0x20   : > { %v1384_v3 = vpack.c.bf16 %v1889_v0, %v1887_v63  ;;  %v547_v6 = vld [vmem:[%s2108_s4 + $0x8] sm:$0xf]  ;;  %v1388_v7 = vpack.c.bf16 %v1895_v5, %v1893_v4  ;;  %v646_v8 = vld [vmem:[%s2109_s5] sm:$0xff]  ;;  %v743_v13 = vld [vmem:[%s2112_s8 + $0x18] sm:$0xff]  ;;  %p1519_p2 = scmp.lt.s32.totalorder %s1517_s29, %s1511_s24 }
  0x21   : > { %1363 = vmatpush3.bf16.msra.mxu0 %v1362_v26  ;;  %637 = vperm.xlu0 %1485, %v434_v55   ;;  %v647_v9 = vld [vmem:[%s2109_s5 + $0x8] sm:$0xf]  ;;  %v734_v10 = vld [vmem:[%s2111_s7] sm:$0xff]  ;;  %vm1393_vm5 = vmpackc.low %vm795_vm3, %vm1624_vm4 }
  0x22   : > { %1365 = vmatprep.subr.bf16.mxu0 %v1364_v27  ;;  %v740_v11 = vld [vmem:[%s2112_s8] sm:$0xff]  ;;  %v741_v12 = vld [vmem:[%s2112_s8 + $0x8] sm:$0xff]  ;;  %v736_v26 = vld [vmem:[%s2111_s7 + $0x10] sm:$0xff]  ;;  %p1520_p3 = por %p1519_p2, %p1518_p1 }
  0x23   : > { %748 = vperm.xlu1 %1486, %v740_v11   ;;  %v745_v14 = vld [vmem:[%s2112_s8 + $0x28] sm:$0xff]  ;;  %v737_v27 = vld [vmem:[%s2111_s7 + $0x18] sm:$0xff]  ;;  %v738_v28 = vld [vmem:[%s2111_s7 + $0x20] sm:$0xff] }
  0x24   : > { %v735_v24 = vld [vmem:[%s2111_s7 + $0x8] sm:$0xff]  ;;  %v933_v31 = vld [vmem:[%s2107_s3 + $0x18] sm:$0xff]  ;;  %v932_v34 = vld [vmem:[%s2107_s3 + $0x10] sm:$0xff]  ;;  %p1521_p5 = pnand %p1520_p3, %p1514_p0 }
  0x25   : > { %1367 = vmatpush3.bf16.msra.mxu0 %v1366_v32  ;;  %758 = vperm.xlu0 %1485, %v742_v56   ;;  %v739_v29 = vld [vmem:[%s2111_s7 + $0x28] sm:$0xff]  ;;  %v937_v37 = vld [vmem:[%s2107_s3 + $0x38] sm:$0xff]  ;;  %v936_v40 = vld [vmem:[%s2107_s3 + $0x30] sm:$0xff] }
  0x26   : > { %1369 = vmatprep.subr.bf16.mxu0 %v1368_v33  ;;  %v931_v30 = vld [vmem:[%s2107_s3 + $0x8] sm:$0xff]  ;;  %v930_v33 = vld [vmem:[%s2107_s3] sm:$0xff]  ;;  %v941_v43 = vld [vmem:[%s2107_s3 + $0x58] sm:$0xff] }
  0x27   : > { %753 = vperm.xlu1 %1486, %v741_v12   ;;  %v1398_v32 = vpack.c.bf16 %v933_v31, %v931_v30  ;;  %v1400_v35 = vpack.c.bf16 %v932_v34, %v930_v33  ;;  %v935_v36 = vld [vmem:[%s2107_s3 + $0x28] sm:$0xff]  ;;  %v940_v46 = vld [vmem:[%s2107_s3 + $0x50] sm:$0xff]  ;;  %v945_v52 = vld [vmem:[%s2107_s3 + $0x78] sm:$0xff] }
  0x28   : > { %v939_v42 = vld [vmem:[%s2107_s3 + $0x48] sm:$0xff]  ;;  %v942_v54 = vld [vmem:[%s2107_s3 + $0x60] sm:$0xff]  ;;  %v944_v55 = vld [vmem:[%s2107_s3 + $0x70] sm:$0xff] }
  0x29   : > { %1371 = vmatpush3.bf16.msra.mxu0 %v1370_v38  ;;  %768 = vperm.xlu0 %1485, %v744_v57   ;;  %v1402_v38 = vpack.c.bf16 %v937_v37, %v935_v36  ;;  %v1412_v56 = vpack.c.bf16 %v944_v55, %v942_v54  ;;  %v1625_v57 = vmov 0.0  }
  0x2a   : > { %1373 = vmatprep.subr.bf16.mxu0 %v1372_v39  ;;  %v934_v39 = vld [vmem:[%s2107_s3 + $0x20] sm:$0xff] }
  0x2b   : > { %763 = vperm.xlu1 %1486, %v743_v13   ;;  %v1404_v41 = vpack.c.bf16 %v936_v40, %v934_v39 }
  0x2d   : > { %1375 = vmatpush3.bf16.msra.mxu0 %v1374_v44  ;;  %v1406_v44 = vpack.c.bf16 %v941_v43, %v939_v42 }
  0x2e   : > { %1377 = vmatprep.subr.bf16.mxu0 %v1376_v45  ;;  %v938_v45 = vld [vmem:[%s2107_s3 + $0x40] sm:$0xff] }
  0x2f   : > { %773 = vperm.xlu1 %1486, %v745_v14   ;;  %v1408_v47 = vpack.c.bf16 %v940_v46, %v938_v45 }
  0x31   : > { %1379 = vmatpush3.bf16.msra.mxu0 %v1378_v48  ;;  %v943_v48 = vld [vmem:[%s2107_s3 + $0x68] sm:$0xff] }
  0x32   : > { %v1410_v53 = vpack.c.bf16 %v945_v52, %v943_v48 }
  0x34   : > { %536 = vmatmul.mubr.f32.vlgmr.msra.gmra.mrb[0].mxu0 %v1855_v49 }
  0x35   : > { %540 = vmatprep.mubr.f32.mxu0 %v1858_v50 }
  0x38   : > { %541 = vmatmul.mubr.f32.gmra.mrb[2].mxu0 %v1863_v51 }
  0x9c   : > { %v633_v15 = vpop.permute.xlu0 %632 }
  0xa0   : > { %v638_v16 = vpop.permute.xlu0 %637 }
 0x107   : > { %v1293_v58 = vpop.f32.mrb[0].mxu0 }
 0x108   : > { %v1294_v59 = vpop.f32.mrb[1].mxu0 }
 0x109   : > { %v1295_v60 = vadd.f32 %v1294_v59, %v1293_v58  ;;  %v749_v58 = vpop.permute.xlu1 %748 }
 0x10b   : > { %v1296_v61 = vpop.f32.mrb[2].mxu0 }
 0x10c   : > { %v1297_v62 = vpop.f32.mrb[3].mxu0 }
 0x10d   : > { %v1298_v1 = vadd.f32 %v1297_v62, %v1296_v61  ;;  %v754_v59 = vpop.permute.xlu1 %753 }
 0x10f   : > { %v1380_v2 = vpack.c.bf16 %v1298_v1, %v1295_v60 }
 0x111   : > { %1381 = vmatprep.subr.bf16.mxu1 %v1380_v2  ;;  %v764_v1 = vpop.permute.xlu1 %763 }
 0x112   : > { %1383 = vmatpush3.bf16.msra.mxu1 %v1380_v2 }
 0x113   : > { %1385 = vmatprep.subr.bf16.mxu1 %v1384_v3 }
 0x115   : > { %1322 = vmatmul.mubr.msk.f32.vlgmr.msra.gmra.mrb[0].mxu1 %vm548_vm0, %v547_v6  ;;  %v774_v13 = vpop.permute.xlu1 %773 }
 0x116   : > { %1387 = vmatpush3.bf16.msra.mxu1 %v1384_v3  ;;  %1332 = vmatprep.mubr.msk.f32.mxu1 %vm648_vm1, %v646_v8  ;;  %v759_v3 = vpop.permute.xlu0 %758 }
 0x117   : > { %1389 = vmatprep.subr.bf16.mxu1 %v1388_v7 }
 0x11a   : > { %1391 = vmatpush3.bf16.msra.mxu1 %v1388_v7 }
 0x11d   : > { %1333 = vmatmul.mubr.msk.f32.vlgmr.msra.gmra.mrb[0].mxu1 %vm648_vm1, %v647_v9 }
 0x11e   : > { %1339 = vmatprep.mubr.msk.f32.mxu1 %vm776_vm2, %v734_v10 }
 0x1f0   : > { %v1334_v17 = vpop.f32.mrb[0].mxu1 }
 0x1f1   : > { %v1414_v18 = vadd.f32 %v1334_v17, %v638_v16  ;;  %v721_v19 = vpop.f32.mrb[1].mxu1  ;;  %v769_v16 = vpop.permute.xlu0 %768 }
 0x1f2   : > { %v1415_v20 = vadd.f32 %v721_v19, %v633_v15 }
 0x1f3   : > { %v733_v21 = vmax.f32 %v1414_v18, 0.0 }
 0x1f4   : > { %v732_v22 = vmax.f32 %v1415_v20, 0.0 }
 0x1f6   : > { %v1392_v23 = vpack.c.bf16 %v733_v21, %v732_v22 }
 0x1f8   : > { %1394 = vmatprep.subr.msk.bf16.mxu1 %vm1393_vm5, %v1392_v23 }
 0x1f9   : > { %1397 = vmatpush3.bf16.msk.msra.mxu1 %vm1393_vm5, %v1392_v23 }
 0x1fa   : > { %1399 = vmatprep.subr.bf16.mxu1 %v1398_v32 }
 0x1fc   : > { %1340 = vmatmul.mubr.msk.f32.vlgmr.msra.gmra.mrb[2].mxu1 %vm776_vm2, %v735_v24 }
 0x1fd   : > { %1342 = vmatprep.mubr.msk.f32.mxu1 %vm776_vm2, %v736_v26  ;;  %1401 = vmatpush1.bf16.msra.mxu1 %v1400_v35 }
 0x1fe   : > { %1403 = vmatprep.subr.bf16.mxu1 %v1402_v38 }
 0x200   : > { %1343 = vmatmul.mubr.msk.f32.gmra.mrb[4].mxu1 %vm776_vm2, %v737_v27 }
 0x201   : > { %1345 = vmatprep.mubr.msk.f32.mxu1 %vm776_vm2, %v738_v28  ;;  %1405 = vmatpush1.bf16.msra.mxu1 %v1404_v41 }
 0x202   : > { %1407 = vmatprep.subr.bf16.mxu1 %v1406_v44 }
 0x204   : > { %1346 = vmatmul.mubr.msk.f32.gmra.mrb[6].mxu1 %vm776_vm2, %v739_v29 }
 0x205   : > { %1409 = vmatpush1.bf16.msra.mxu1 %v1408_v47  ;;  %1017 = vmatprep.mubr.f32.mxu1 %v1625_v57 }
 0x206   : > { %1411 = vmatprep.subr.bf16.mxu1 %v1410_v53 }
 0x209   : > { %1413 = vmatpush1.bf16.msra.mxu1 %v1412_v56 }
 0x2cf   : > { %v1341_v60 = vpop.f32.mrb[2].mxu1 }
 0x2d0   : > { %v871_v61 = vadd.f32 %v1341_v60, %v754_v59  ;;  %v865_v62 = vpop.f32.mrb[3].mxu1 }
 0x2d1   : > { %v866_v2 = vadd.f32 %v865_v62, %v749_v58 }
 0x2d2   : > { %v1242_v6 = vmul.f32 -1.442695, %v871_v61 }
 0x2d3   : > { %v1241_v7 = vmul.f32 -1.442695, %v866_v2  ;;  %v1344_v8 = vpop.f32.mrb[4].mxu1 }
 0x2d4   : > { %1487 = vpow2.f32 %v1242_v6  ;;  %v881_v9 = vadd.f32 %v1344_v8, %v764_v1  ;;  %v875_v10 = vpop.f32.mrb[5].mxu1 }
 0x2d5   : > { %1489 = vpow2.f32 %v1241_v7  ;;  %v876_v11 = vadd.f32 %v875_v10, %v759_v3 }
 0x2d6   : > { %v1244_v12 = vmul.f32 -1.442695, %v881_v9 }
 0x2d7   : > { %v1243_v14 = vmul.f32 -1.442695, %v876_v11  ;;  %v1347_v15 = vpop.f32.mrb[6].mxu1 }
 0x2d8   : > { %1491 = vpow2.f32 %v1244_v12  ;;  %v891_v17 = vadd.f32 %v1347_v15, %v774_v13  ;;  %v885_v18 = vpop.f32.mrb[7].mxu1 }
 0x2d9   : > { %1493 = vpow2.f32 %v1243_v14  ;;  %v886_v19 = vadd.f32 %v885_v18, %v769_v16 }
 0x2da   : > { %v1246_v20 = vmul.f32 -1.442695, %v891_v17 }
 0x2db   : > { %v1245_v21 = vmul.f32 -1.442695, %v886_v19 }
 0x2dc   : > { %1495 = vpow2.f32 %v1246_v20 }
 0x2dd   : > { %1497 = vpow2.f32 %v1245_v21 }
 0x2de   : > { %v1488_v22 = vpop.eup %1487 }
 0x2df   : > { %v1490_v23 = vpop.eup %1489  ;;  %v913_v24 = vadd.f32 1.0, %v1488_v22 }
 0x2e0   : > { %v912_v26 = vadd.f32 1.0, %v1490_v23 }
 0x2e2   : > { %v1492_v27 = vpop.eup %1491  ;;  %1499 = vrcp.f32 %v912_v26 }
 0x2e3   : > { %v1494_v28 = vpop.eup %1493  ;;  %v915_v29 = vadd.f32 1.0, %v1492_v27  ;;  %1501 = vrcp.f32 %v913_v24 }
 0x2e4   : > { %v914_v30 = vadd.f32 1.0, %v1494_v28 }
 0x2e5   : > { %1503 = vrcp.f32 %v915_v29 }
 0x2e6   : > { %v1496_v31 = vpop.eup %1495  ;;  %1505 = vrcp.f32 %v914_v30 }
 0x2e7   : > { %v1498_v32 = vpop.eup %1497  ;;  %v917_v33 = vadd.f32 1.0, %v1496_v31 }
 0x2e8   : > { %v916_v34 = vadd.f32 1.0, %v1498_v32 }
 0x2e9   : > { %1507 = vrcp.f32 %v917_v33 }
 0x2ea   : > { %1509 = vrcp.f32 %v916_v34 }
 0x2ec   : > { %v1500_v35 = vpop.eup %1499 }
 0x2ed   : > { %1247 = vmatmul.mubr.msk.f32.vlgmr.msra.gmra.mrb[8].mxu1 %vm946_vm6, %v1500_v35  ;;  %v1502_v36 = vpop.eup %1501 }
 0x2ee   : > { %1023 = vmatprep.mubr.f32.mxu1 %v1625_v57 }
 0x2ef   : > { %v1504_v37 = vpop.eup %1503 }
 0x2f0   : > { %v1506_v38 = vpop.eup %1505  ;;  %v1043_v39 = vmul.f32 %v1504_v37, %v1889_v0 }
 0x2f1   : > { %v1042_v40 = vmul.f32 %v1506_v38, %v1887_v63  ;;  %1248 = vmatmul.mubr.msk.f32.gmra.mrb[10].mxu1 %vm946_vm6, %v1502_v36 }
 0x2f2   : > { %1047 = vst.msk [vmem:[%s413_s12 + $0x8] sm:$0xff] %vm946_vm6, %v1043_v39 }
 0x2f3   : > { %v1508_v41 = vpop.eup %1507  ;;  %1046 = vst.msk [vmem:[%s413_s12] sm:$0xff] %vm946_vm6, %v1042_v40 }
 0x2f4   : > { %v1510_v42 = vpop.eup %1509  ;;  %v1045_v43 = vmul.f32 %v1508_v41, %v1895_v5 }
 0x2f5   : > { %v1044_v44 = vmul.f32 %v1510_v42, %v1893_v4 }
 0x2f6   : > { %1049 = vst.msk [vmem:[%s413_s12 + $0x18] sm:$0xff] %vm946_vm6, %v1045_v43 }
 0x2f7   : > { %1048 = vst.msk [vmem:[%s413_s12 + $0x10] sm:$0xff] %vm946_vm6, %v1044_v44 }
 0x2f8   : > { %1524 = shalt.err (!%p1521_p5)
}
 0x2f9   : > { %s1525_s12 = scalar_lea.hbm %s2017_s22, 512  ;;  %s1529_s27 = scalar_lea.hbm %s2114_s10, 1024 }
 0x2fa   : > { %p1526_p6 = scmp.ne.s32.totalorder %s2017_s22, %s1525_s12  ;;  %p1530_p10 = scmp.lt.u32.totalorder %s2017_s22, %s2114_s10 }
 0x2fb   : > { %p1531_p11 = scmp.lt.u32.totalorder %s1529_s27, %s1525_s12  ;;  %p1533_p13 = scmp.lt.u32.totalorder %s1525_s12, %s2017_s22 }
 0x2fc   : > { %p1527_p7 = pnand %p1526_p6, %p1727_p4 }
 0x2fd   : > { %p1532_p12 = por %p1531_p11, %p1530_p10 }
 0x2fe   : > { %p1528_p9 = pneg %p1527_p7 }
 0x2ff   : > { %p1534_p0 = por %p1533_p13, %p1532_p12 }
 0x301   : > { %p1535_p1 = pnand %p1534_p0, %p1528_p9 }
 0x303   : > { %1538 = shalt.err (!%p1535_p1)
}
 0x304   : > { %s1627_s24 = smov 128   ;;  %s1628_s29 = smov 8  }
 0x305   : > { %1419 = dma.vmem_to_hbm [thread:$0]  (%p1727_p4), %s2010_s21, 512, %s2017_s22, %s1056_s28, %s1627_s24, %s1627_s24, %s1628_s29  }
 0x306   : > { %s406_s19 = scalar_lea.vmem [#allocation2], %s1224_s11  ;;  %s2123_s21 = sshll.u32 %s1613_s16, 9 }
 0x307   : > { %s1071_s12 = sshll.u32 %s406_s19, 4  ;;  %s2055_s11 = scalar_lea.hbm %s2113_s9, %s2123_s21  ;;  %s2047_s12 = int_to_ptr.vmem [resolvable:$true] %s1071_s12 }
 0x308   : > { %s1051_s17 = scalar_lea.sflag [#allocation3], %s1994_s30  ;;  %s1539_s20 = scalar_lea.vmem %s2047_s12, 512 }
 0x309   : > { %p1540_p2 = scmp.ne.s32.totalorder %s2047_s12, %s1539_s20  ;;  %s1629_s27 = smov [#allocation2]  }
 0x30a   : > { %s1543_s26 = sshll.u32 %s1629_s27, 4  ;;  %s1544_s26 = int_to_ptr.vmem [resolvable:$false] %s1543_s26 }
 0x30b   : > { %p1541_p3 = pnand %p1540_p2, %p1727_p4  ;;  %s1545_s24 = scalar_lea.vmem %s1544_s26, 1024 }
 0x30c   : > { %p1546_p6 = scmp.lt.s32.totalorder %s2047_s12, %s1544_s26  ;;  %p1547_p7 = scmp.lt.s32.totalorder %s1545_s24, %s1539_s20 }
 0x30d   : > { %p1542_p5 = pneg %p1541_p3 }
 0x30e   : > { %p1548_p9 = por %p1547_p7, %p1546_p6 }
 0x310   : > { %p1549_p10 = pnand %p1548_p9, %p1542_p5 }
 0x3c0   : > { %v1019_v63 = vpop.f32.mrb[8].mxu1 }
 0x3c1   : > { %v1030_v0 = vmul.f32 %v1019_v63, %v1855_v49  ;;  %v1021_v4 = vpop.f32.mrb[9].mxu1 }
 0x3c2   : > { %v1031_v5 = vmul.f32 %v1021_v4, %v1809_v25 }
 0x3c3   : > { %1034 = vst [vmem:[%s406_s19] sm:$0xff] %v1030_v0 }
 0x3c4   : > { %1035 = vst [vmem:[%s406_s19 + $0x8] sm:$0xff] %v1031_v5  ;;  %v1025_v45 = vpop.f32.mrb[10].mxu1 }
 0x3c5   : > { %v1032_v46 = vmul.f32 %v1025_v45, %v1863_v51  ;;  %v1027_v47 = vpop.f32.mrb[11].mxu1 }
 0x3c6   : > { %v1033_v49 = vmul.f32 %v1027_v47, %v1858_v50 }
 0x3c7   : > { %1036 = vst [vmem:[%s406_s19 + $0x10] sm:$0xff] %v1032_v46 }
 0x3c8   : > { %1037 = vst [vmem:[%s406_s19 + $0x18] sm:$0xff] %v1033_v49 }
 0x3c9   : > { %1552 = shalt.err (!%p1549_p10)
}
 0x3ca   : > { %s1553_s16 = scalar_lea.hbm %s2055_s11, 512  ;;  %s1557_s21 = scalar_lea.hbm %s2113_s9, 1024 }
 0x3cb   : > { %p1554_p11 = scmp.ne.s32.totalorder %s2055_s11, %s1553_s16  ;;  %p1558_p0 = scmp.lt.u32.totalorder %s2055_s11, %s2113_s9 }
 0x3cc   : > { %p1559_p1 = scmp.lt.u32.totalorder %s1557_s21, %s1553_s16  ;;  %p1561_p3 = scmp.lt.u32.totalorder %s1553_s16, %s2055_s11 }
 0x3cd   : > { %p1555_p12 = pnand %p1554_p11, %p1727_p4 }
 0x3ce   : > { %p1560_p2 = por %p1559_p1, %p1558_p0 }
 0x3cf   : > { %p1556_p13 = pneg %p1555_p12 }
 0x3d0   : > { %p1562_p5 = por %p1561_p3, %p1560_p2 }
 0x3d2   : > { %p1563_p6 = pnand %p1562_p5, %p1556_p13 }
 0x3d4   : > { %1566 = shalt.err (!%p1563_p6)
}
 0x3d5   : > { %s1630_s20 = smov 256   ;;  %s1631_s27 = smov 16  }
 0x3d6   : > { %1418 = dma.vmem_to_hbm [thread:$0]  (%p1727_p4), %s2047_s12, 512, %s2055_s11, %s1051_s17, %s1630_s20, %s1630_s20, %s1631_s27  }
 0x3d7 PF: > { %p1429_p7 = scmp.ge.s32.totalorder %s1621_s18, 2  ;;  %s1103_s26 = sand.u32 1, %s1601_s13  }
 0x3d8   : > { %s1104_s24 = scalar_lea.sflag [#allocation3], %s1103_s26 }
 0x3d9   : > { %p1423_p9 = pnand %p1429_p7, %p1734_p8 }
 0x3db   : > { %1592 = dma.done.wait (!%p1423_p9), %s1104_s24, 512  }
 0x3dc   : > { %1594 = vsyncadd (!%p1423_p9), %s1104_s24, 4294966784  ;;  %s1113_s16 = scalar_lea.sflag [#allocation5], %s1103_s26 }
 0x3dd   : > { %1596 = dma.done.wait (!%p1423_p9), %s1113_s16, 512  }
 0x3de   : > { %1598 = vsyncadd (!%p1423_p9), %s1113_s16, 4294966784  ;;  %s27_s18 = sadd.s32 1, %s1621_s18   ;;  %s2124_s23 = sld [smem:[#allocation10_spill]] }
 0x3df   : > { %p24_p10 = scmp.ge.s32.totalorder %s27_s18, 4   ;;  %s2125_s16 = sld [smem:[#allocation8_spill]] }
 0x3e0   : > { %s2126_s17 = sld [smem:[#allocation9_spill]]  ;;  %s2127_s13 = smov %s1605_s14 }
 0x3e1   : > { %s2128_s14 = smov %s1609_s15  ;;  %26 = sbr.rel (!%p24_p10) target bundleno = 6 (0x6), region = 111 }
 0x3e4   : > { %s2129_s15 = smov %s2124_s23 }
 0x3e8   :  { %1118 = vsyncpa [#allocation3], 1 }
 0x3e9   :  { %1120 = vsyncpa [#allocation3 + $0x1], 1 }
 0x3ea   :  { %1121 = vsyncpa [#allocation5], 1 }
 0x3eb   :  { %1123 = vsyncpa [#allocation5 + $0x1], 1 }

</bundles_post_ra>
